<compile_context>
chip_gen: v7x
topology: tpu7x:2x2x1
jax: 0.10.0
libtpu: 0.0.40
codegen_flags: <defaults>
</compile_context>

<pallas_src>
import jax
import jax.numpy as jnp
from jax.experimental import pallas as pl
from jax.experimental.pallas import tpu as pltpu


def fused_linear_kernel(x_ref, w_ref, b_ref, o_ref):
    # out = x @ W_eff + b_eff   (single MXU dot, f32 accumulate, VPU bias add)
    acc = jnp.dot(x_ref[...], w_ref[...], preferred_element_type=jnp.float32)
    o_ref[...] = (acc + b_ref[...]).astype(o_ref.dtype)


def _round_up(n, m):
    return ((n + m - 1) // m) * m


def simple_model_forward(x, w1, b1, w2, b2, *, tb=1024):
    """x: (B, 10) f32; w1: (10, 20); b1: (1, 20); w2: (20, 5); b2: (1, 5).

    Weights are stored as (in_features, out_features), i.e. already transposed
    relative to torch's nn.Linear.weight, so the kernel does plain x @ W + b.
    """
    # Fold the two affine layers (no activation between them) outside the kernel.
    w_eff = jnp.dot(w1, w2, preferred_element_type=jnp.float32)        # (10, 5)
    b_eff = jnp.dot(b1, w2, preferred_element_type=jnp.float32) + b2   # (1, 5)

    B, K = x.shape
    N = w_eff.shape[1]

    # Batch tile: large (amortizes ~0.35us/step grid overhead, (TB,10) f32 is
    # only TB*40 bytes) but never larger than the (8-aligned) batch itself.
    TB = min(tb, _round_up(B, 8))
    Bp = _round_up(B, TB)
    xp = x if Bp == B else jnp.pad(x, ((0, Bp - B), (0, 0)))

    grid = (Bp // TB,)
    dtype_bytes = jnp.dtype(x.dtype).itemsize

    out = pl.pallas_call(
        fused_linear_kernel,
        out_shape=jax.ShapeDtypeStruct((Bp, N), x.dtype),
        grid=grid,
        in_specs=[
            pl.BlockSpec((TB, K), lambda i: (i, 0)),   # x: tiled over batch
            pl.BlockSpec((K, N), lambda i: (0, 0)),    # W_eff: VMEM-resident
            pl.BlockSpec((1, N), lambda i: (0, 0)),    # b_eff: VMEM-resident
        ],
        out_specs=pl.BlockSpec((TB, N), lambda i: (i, 0)),
        compiler_params=pltpu.CompilerParams(
            dimension_semantics=("parallel",),
        ),
        cost_estimate=pl.CostEstimate(
            flops=2 * Bp * K * N,
            transcendentals=0,
            bytes_accessed=(Bp * K + K * N + N + Bp * N) * dtype_bytes,
        ),
    )(xp, w_eff, b_eff)

    return out[:B] if Bp != B else out


def reference_forward(x, w1, b1, w2, b2):
    return (x @ w1 + b1) @ w2 + b2


if __name__ == "__main__":
    key = jax.random.PRNGKey(0)
    kx, k1, k2, k3, k4 = jax.random.split(key, 5)

    # Deterministic synthetic parameters (shapes from nn.Linear(10,20), nn.Linear(20,5)).
    w1 = jax.random.normal(k1, (10, 20), dtype=jnp.float32) * 0.1
    b1 = jax.random.normal(k2, (1, 20), dtype=jnp.float32) * 0.1
    w2 = jax.random.normal(k3, (20, 5), dtype=jnp.float32) * 0.1
    b2 = jax.random.normal(k4, (1, 5), dtype=jnp.float32) * 0.1

    # Small batch (single tile path).
    B = 8
    x = jax.random.normal(kx, (B, 10), dtype=jnp.float32)
    out = jax.block_until_ready(simple_model_forward(x, w1, b1, w2, b2))
    ref = reference_forward(x, w1, b1, w2, b2)
    assert out.shape == (B, 5), out.shape
    assert jnp.allclose(out, ref, atol=1e-5, rtol=1e-5), "mismatch vs JAX reference (B=8)"

    # Larger-than-tile batch with padding (multi-tile pipelined path).
    B2 = 200
    x2 = jax.random.normal(kx, (B2, 10), dtype=jnp.float32)
    out2 = jax.block_until_ready(simple_model_forward(x2, w1, b1, w2, b2, tb=64))
    ref2 = reference_forward(x2, w1, b1, w2, b2)
    assert out2.shape == (B2, 5), out2.shape
    assert jnp.allclose(out2, ref2, atol=1e-5, rtol=1e-5), "mismatch vs JAX reference (B=200)"

    print("KERNEL_OK")
</pallas_src>

<mosaic_0001>
module attributes {stable_mosaic.version = 11 : i64} {
  func.func @fused_linear_kernel(%arg0: i32, %arg1: memref<8x10xf32, #tpu.memory_space<vmem>>, %arg2: memref<10x5xf32, #tpu.memory_space<vmem>>, %arg3: memref<1x5xf32, #tpu.memory_space<vmem>>, %arg4: memref<8x5xf32, #tpu.memory_space<vmem>>) attributes {dimension_semantics = [#tpu.dimension_semantics<parallel>], iteration_bounds = array<i64: 1>, scalar_prefetch = 0 : i64, scratch_operands = 0 : i64, tpu.core_type = #tpu.core_type<tc>, window_params = [{transform_indices = @transform_0, window_bounds = array<i64: 8, 10>}, {pipeline_mode = #tpu.pipeline_mode<synchronous>, transform_indices = @transform_1, window_bounds = array<i64: 10, 5>}, {pipeline_mode = #tpu.pipeline_mode<synchronous>, transform_indices = @transform_2, window_bounds = array<i64: 1, 5>}, {transform_indices = @transform_3, window_bounds = array<i64: 8, 5>}]} {
    %c0 = arith.constant 0 : index
    %c0_0 = arith.constant 0 : index
    %0 = vector.load %arg1[%c0, %c0_0] : memref<8x10xf32, #tpu.memory_space<vmem>>, vector<8x10xf32>
    %c0_1 = arith.constant 0 : index
    %c0_2 = arith.constant 0 : index
    %1 = vector.load %arg2[%c0_1, %c0_2] : memref<10x5xf32, #tpu.memory_space<vmem>>, vector<10x5xf32>
    %cst = arith.constant dense<0.000000e+00> : vector<8x5xf32>
    %2 = tpu.matmul %0, %1, %cst {dimension_numbers = #tpu.dot_dimension_numbers<[1], [0], [0], [1], [0, 0, 1, 1], [], []>} : vector<8x10xf32>, vector<10x5xf32>, vector<8x5xf32> -> vector<8x5xf32>
    %c0_3 = arith.constant 0 : index
    %c0_4 = arith.constant 0 : index
    %3 = vector.load %arg3[%c0_3, %c0_4] : memref<1x5xf32, #tpu.memory_space<vmem>>, vector<1x5xf32>
    %4 = vector.broadcast %3 : vector<1x5xf32> to vector<8x5xf32>
    %5 = arith.addf %2, %4 : vector<8x5xf32>
    %c0_5 = arith.constant 0 : index
    %c0_6 = arith.constant 0 : index
    %6 = vector.load %arg4[%c0_5, %c0_6] : memref<8x5xf32, #tpu.memory_space<vmem>>, vector<8x5xf32>
    tpu.vector_store %arg4[%c0_5, %c0_6], %5 {strides = array<i32>} : memref<8x5xf32, #tpu.memory_space<vmem>>, vector<8x5xf32>,
    return
  }
  func.func @transform_0(%arg0: i32) -> (i32, i32) {
    %c0_i32 = arith.constant 0 : i32
    %c0_i32_0 = arith.constant 0 : i32
    return %arg0, %c0_i32 : i32, i32
  }
  func.func @transform_1(%arg0: i32) -> (i32, i32) {
    %c0_i32 = arith.constant 0 : i32
    %c0_i32_0 = arith.constant 0 : i32
    %c0_i32_1 = arith.constant 0 : i32
    return %c0_i32, %c0_i32_0 : i32, i32
  }
  func.func @transform_2(%arg0: i32) -> (i32, i32) {
    %c0_i32 = arith.constant 0 : i32
    %c0_i32_0 = arith.constant 0 : i32
    %c0_i32_1 = arith.constant 0 : i32
    return %c0_i32, %c0_i32_0 : i32, i32
  }
  func.func @transform_3(%arg0: i32) -> (i32, i32) {
    %c0_i32 = arith.constant 0 : i32
    %c0_i32_0 = arith.constant 0 : i32
    return %arg0, %c0_i32 : i32, i32
  }
}

</mosaic_0001>

<bundles_post_ra>
// kernel: tpu_custom_call.1
= control target key start
LH: loop header
LB: loop body
LE: loop exit
PB: predicated region body
PF: predicated region fallthrough
CT: control target
= control target key end

     0   :  { %vm29_vm0 = vcmask 1041408   ;;  %v165_v2 = vmov 0.0|0.0   ;;  %vm166_vm1 = vmmov 1   ;;  %vm167_vm3 = vmmov 0   ;;  %s214_s0 = inlined_call_operand.vmem [shape: f32[8,10], index: 0, kind: input, shape index: {}]   ;;  %s215_s1 = inlined_call_operand.vmem [shape: f32[10,5], index: 1, kind: input, shape index: {}]   ;;  %s216_s2 = inlined_call_operand.vmem [shape: f32[1,5], index: 2, kind: input, shape index: {}]   ;;  %s217_s3 = inlined_call_operand.hbm [shape: f32[8,5], index: 3, kind: output, shape index: {}]  }
   0x1   :  { %v16_v0 = vld [vmem:[%s215_s1] sm:$0xff]  ;;  %v17_v1 = vld [vmem:[%s215_s1 + $0x8] sm:$0x3]  ;;  %132 = vmatprep.subr.bf16.mxu0 %v165_v2  ;;  %vm134_vm2 = vmpackc.low %vm29_vm0, %vm166_vm1  ;;  %v168_v4 = vmov 0.0  }
   0x2   :  { %v133_v3 = vpack.c.bf16 %v17_v1, %v16_v0  ;;  %129 = vmatprep.mubr.msk.f32.mxu0 %vm167_vm3, %v168_v4 }
   0x3   :  { %8 = vsyncpa [#allocation3], 0  ;;  %v15_v5 = vld [vmem:[%s214_s0] sm:$0xff]  ;;  %vm25_vm4 = vcmask 80896   ;;  %s169_s1 = smov [#allocation2]   ;;  %vm103_vm5 = vcmask 39936  }
   0x4   :  { %135 = vmatpush3.bf16.msk.msra.mxu0 %vm134_vm2, %v133_v3  ;;  %v119_v6 = vld [vmem:[%s216_s2] ss:$0 sm:$0xff]  ;;  %s111_s20 = sshll.u32 %s169_s1, 4  ;;  %s112_s20 = int_to_ptr.vmem [resolvable:$true] %s111_s20 }
   0x5   :  { %s141_s21 = scalar_lea.vmem %s112_s20, 128  ;;  %p146_p1 = scmp.lt.s32.totalorder %s112_s20, %s112_s20 }
   0x6   :  { %p142_p0 = scmp.ne.s32.totalorder %s112_s20, %s141_s21  ;;  %p147_p2 = scmp.lt.s32.totalorder %s141_s21, %s141_s21 }
   0x7   :  { %130 = vmatmul.mubr.msk.f32.vlgmr.msra.gmra.mrb[0].mxu0 %vm25_vm4, %v15_v5 }
   0x8   :  { %p148_p3 = por %p147_p2, %p146_p1 }
   0xa   :  { %p149_p4 = pnand %p148_p3, %p142_p0 }
  0xda   :  { %v99_v7 = vpop.f32.mrb[0].mxu0 }
  0xdb   :  { %v100_v8 = vadd.f32 %v119_v6, %v99_v7  ;;  %v131_v9 = vpop.f32.mrb[1].mxu0 }
  0xdd   :  { %104 = vst.msk [vmem:[#allocation2] sm:$0xff] %vm103_vm5, %v100_v8 }
  0xde   :  { %152 = shalt.err (!%p149_p4)
}
  0xdf   :  { %s153_s23 = scalar_lea.hbm %s217_s3, 128 }
  0xe0   :  { %p154_p5 = scmp.ne.s32.totalorder %s217_s3, %s153_s23  ;;  %p157_p6 = scmp.lt.u32.totalorder %s153_s23, %s217_s3 }
  0xe2   :  { %p159_p7 = pnand %p157_p6, %p154_p5 }
  0xe4   :  { %162 = shalt.err (!%p159_p7)
}
  0xe5   :  { %114 = dma.vmem_to_hbm [thread:$0]  %s112_s20, 128, %s217_s3, [#allocation3]  }
  0xe6   :  { %163 = dma.done.wait [#allocation3], 128  }
  0xe7   :  { %164 = vsyncadd [#allocation3], 4294967168 }
  0xe8   :  { %118 = vsyncpa [#allocation3], 1 }

</bundles_post_ra>
